<compile_context>
chip_gen: v7x
topology: tpu7x:2x2x1
jax: 0.10.0
libtpu: 0.0.40
codegen_flags: <defaults>
</compile_context>

<pallas_src>
import functools

import jax
import jax.numpy as jnp
from jax.experimental import pallas as pl
from jax.experimental.pallas import tpu as pltpu

_INV_PI = float(1.0 / jnp.pi)

# Asymptotic series for lgamma(w + 1/2) - lgamma(w) - 0.5*log(w), valid for w >= ~3:
#   -1/(8w) + 1/(192 w^3) - 1/(640 w^5) + 17/(14336 w^7)
_C1 = -0.125
_C3 = 1.0 / 192.0
_C5 = -1.0 / 640.0
_C7 = 17.0 / 14336.0


def _t_nll_kernel(x_ref, mu_ref, sigma_ref, nu_ref, out_ref, acc_ref, *,
                  n_valid, needs_mask):
    """One (tm, 128) tile: elementwise Student-t log-likelihood, accumulated in VMEM."""
    i = pl.program_id(1)

    @pl.when(i == 0)
    def _():
        acc_ref[...] = jnp.zeros_like(acc_ref)

    x = x_ref[...].astype(jnp.float32)
    mu = mu_ref[...].astype(jnp.float32)
    sigma = sigma_ref[...].astype(jnp.float32) + 1e-6
    nu = nu_ref[...].astype(jnp.float32)

    sig2 = sigma * sigma
    inv = 1.0 / (sig2 * nu)                      # divide 1 (shared by term2-fusion & z^2/nu)
    diff = x - mu
    z2_over_nu = diff * diff * inv

    # term1 = lgamma((nu+1)/2) - lgamma(nu/2), via 3-step recurrence + asymptotic series.
    # Works for every nu > 0 (no Lanczos / reflection needed), error < ~1e-7.
    h = nu * 0.5
    w = h + 3.0
    rw = 1.0 / w                                 # divide 2
    rw2 = rw * rw
    poly = rw * (_C1 + rw2 * (_C3 + rw2 * (_C5 + rw2 * _C7)))
    num = h * (h + 1.0) * (h + 2.0)
    den = (h + 0.5) * (h + 1.5) * (h + 2.5)
    corr = jnp.log(num / den)                    # divide 3, log 1

    # Fuse term1's 0.5*log(w) with term2 = -0.5*log(nu*pi*sigma^2):
    #   0.5*log(w) - 0.5*log(nu*pi*sigma^2) = 0.5*log(w * inv / pi)
    t12 = 0.5 * jnp.log(w * inv * _INV_PI) + poly + corr      # log 2
    term3 = -(nu + 1.0) * 0.5 * jnp.log(1.0 + z2_over_nu)     # log 3

    ll = t12 + term3

    if needs_mask:  # static Python flag; only emitted when the slab carries padding
        tm, lane = x_ref.shape
        base = (pl.program_id(0) * pl.num_programs(1) + i) * tm
        row = jax.lax.broadcasted_iota(jnp.int32, (tm, lane), 0)
        col = jax.lax.broadcasted_iota(jnp.int32, (tm, lane), 1)
        idx = (base + row) * lane + col
        ll = jnp.where(idx < n_valid, ll, 0.0)

    acc_ref[...] += ll                            # pure VPU add; no per-step XLU reduce

    @pl.when(i == pl.num_programs(1) - 1)
    def _():
        out_ref[...] = jnp.broadcast_to(jnp.sum(acc_ref[...]), out_ref.shape)


def t_distribution_loss(x, mu, sigma, nu, *, block_rows=2048, lane=128):
    assert x.shape == mu.shape == sigma.shape == nu.shape
    n = x.size
    rows = -(-n // lane)                              # cdiv
    tm = min(block_rows, ((rows + 7) // 8) * 8)       # multiple of 8, <= block_rows
    blocks = -(-rows // tm)
    aligned = (n == rows * lane) and (rows % tm == 0)
    if (not aligned) and blocks >= 2 and blocks % 2 == 1:
        blocks += 1          # padding is required anyway; make block count even for 2-core split
    ncores = 2 if (blocks >= 2 and blocks % 2 == 0) else 1
    steps = blocks // ncores
    rows_pad = blocks * tm
    padded = rows_pad * lane
    needs_mask = padded != n

    def prep(a, pad_val):
        flat = jnp.ravel(a)                            # free for contiguous arrays
        if needs_mask:
            flat = jnp.pad(flat, (0, padded - n), constant_values=pad_val)
        return flat.reshape(rows_pad, lane)            # dtype kept; kernel upcasts to f32

    xf = prep(x, 0.0)
    muf = prep(mu, 0.0)
    sigf = prep(sigma, 1.0)   # benign positive padding (zeroed by the in-kernel mask)
    nuf = prep(nu, 2.0)

    tile_spec = pl.BlockSpec((tm, lane), lambda c, i: (c * steps + i, 0))

    out = pl.pallas_call(
        functools.partial(_t_nll_kernel, n_valid=n, needs_mask=needs_mask),
        out_shape=jax.ShapeDtypeStruct((ncores, 8, lane), jnp.float32),
        grid_spec=pltpu.PrefetchScalarGridSpec(
            num_scalar_prefetch=0,
            grid=(ncores, steps),
            in_specs=[tile_spec, tile_spec, tile_spec, tile_spec],
            out_specs=pl.BlockSpec((1, 8, lane), lambda c, i: (c, 0, 0)),
            scratch_shapes=[pltpu.VMEM((tm, lane), jnp.float32)],
        ),
        compiler_params=pltpu.CompilerParams(
            dimension_semantics=("parallel", "arbitrary"),
            vmem_limit_bytes=32 * 1024 * 1024,
        ),
    )(xf, muf, sigf, nuf)

    return -jnp.sum(out[:, 0, 0]) / n


# ---------------------------------------------------------------------------
# Reference (plain JAX) for correctness checking.
# ---------------------------------------------------------------------------
def _reference(x, mu, sigma, nu):
    sigma = sigma + 1e-6
    term1 = jax.scipy.special.gammaln((nu + 1.0) / 2.0) - jax.scipy.special.gammaln(nu / 2.0)
    term2 = -0.5 * jnp.log(nu * jnp.pi * sigma ** 2)
    term3 = -(nu + 1.0) / 2.0 * jnp.log(1.0 + (1.0 / nu) * ((x - mu) / sigma) ** 2)
    return -(term1 + term2 + term3).mean()


if __name__ == "__main__":
    key = jax.random.PRNGKey(0)
    k_x, k_mu, k_sig, k_nu = jax.random.split(key, 4)

    shape = (2, 4, 16, 16)  # (N, C, H, W); the module has no learned parameters
    x = jax.random.normal(k_x, shape, dtype=jnp.float32)
    mu = jax.random.normal(k_mu, shape, dtype=jnp.float32) * 0.5
    sigma = jax.random.uniform(k_sig, shape, dtype=jnp.float32, minval=0.5, maxval=2.0)
    nu = jax.random.uniform(k_nu, shape, dtype=jnp.float32, minval=2.0, maxval=10.0)

    nll = jax.block_until_ready(t_distribution_loss(x, mu, sigma, nu))
    ref = jax.block_until_ready(_reference(x, mu, sigma, nu))
    if not jnp.allclose(nll, ref, rtol=1e-4, atol=1e-4):
        raise AssertionError(f"mismatch: pallas={nll} ref={ref}")

    print("KERNEL_OK")
</pallas_src>

<mosaic_0001>
module attributes {stable_mosaic.version = 11 : i64} {
  func.func @_t_nll_kernel(%arg0: i32, %arg1: i32, %arg2: memref<16x128xf32, #tpu.memory_space<vmem>>, %arg3: memref<16x128xf32, #tpu.memory_space<vmem>>, %arg4: memref<16x128xf32, #tpu.memory_space<vmem>>, %arg5: memref<16x128xf32, #tpu.memory_space<vmem>>, %arg6: memref<1x8x128xf32, #tpu.memory_space<vmem>>, %arg7: memref<16x128xf32, #tpu.memory_space<vmem>>) attributes {dimension_semantics = [#tpu.dimension_semantics<parallel>, #tpu.dimension_semantics<arbitrary>], iteration_bounds = array<i64: 1, 1>, scalar_prefetch = 0 : i64, scratch_operands = 1 : i64, tpu.core_type = #tpu.core_type<tc>, window_params = [{transform_indices = @transform_0, window_bounds = array<i64: 16, 128>}, {transform_indices = @transform_1, window_bounds = array<i64: 16, 128>}, {transform_indices = @transform_2, window_bounds = array<i64: 16, 128>}, {transform_indices = @transform_3, window_bounds = array<i64: 16, 128>}, {transform_indices = @transform_4, window_bounds = array<i64: 1, 8, 128>}]} {
    %c0_i32 = arith.constant 0 : i32
    %0 = arith.cmpi eq, %arg1, %c0_i32 : i32
    %1 = arith.extui %0 : i1 to i32
    %c0_i32_0 = arith.constant 0 : i32
    %2 = arith.cmpi ne, %1, %c0_i32_0 : i32
    scf.if %2 {
      %cst_33 = arith.constant 0.000000e+00 : f32
      %75 = vector.broadcast %cst_33 : f32 to vector<16x128xf32>
      %c0_34 = arith.constant 0 : index
      %c0_35 = arith.constant 0 : index
      %76 = vector.load %arg7[%c0_34, %c0_35] : memref<16x128xf32, #tpu.memory_space<vmem>>, vector<16x128xf32>
      tpu.vector_store %arg7[%c0_34, %c0_35], %75 {strides = array<i32>} : memref<16x128xf32, #tpu.memory_space<vmem>>, vector<16x128xf32>,
    } else {
    }
    %c0 = arith.constant 0 : index
    %c0_1 = arith.constant 0 : index
    %3 = vector.load %arg2[%c0, %c0_1] : memref<16x128xf32, #tpu.memory_space<vmem>>, vector<16x128xf32>
    %c0_2 = arith.constant 0 : index
    %c0_3 = arith.constant 0 : index
    %4 = vector.load %arg3[%c0_2, %c0_3] : memref<16x128xf32, #tpu.memory_space<vmem>>, vector<16x128xf32>
    %c0_4 = arith.constant 0 : index
    %c0_5 = arith.constant 0 : index
    %5 = vector.load %arg4[%c0_4, %c0_5] : memref<16x128xf32, #tpu.memory_space<vmem>>, vector<16x128xf32>
    %cst = arith.constant 9.99999997E-7 : f32
    %6 = vector.broadcast %cst : f32 to vector<16x128xf32>
    %7 = arith.addf %5, %6 : vector<16x128xf32>
    %c0_6 = arith.constant 0 : index
    %c0_7 = arith.constant 0 : index
    %8 = vector.load %arg5[%c0_6, %c0_7] : memref<16x128xf32, #tpu.memory_space<vmem>>, vector<16x128xf32>
    %9 = arith.mulf %7, %7 : vector<16x128xf32>
    %10 = arith.mulf %9, %8 : vector<16x128xf32>
    %cst_8 = arith.constant 1.000000e+00 : f32
    %11 = vector.broadcast %cst_8 : f32 to vector<16x128xf32>
    %12 = arith.divf %11, %10 : vector<16x128xf32>
    %13 = arith.subf %3, %4 : vector<16x128xf32>
    %14 = arith.mulf %13, %13 : vector<16x128xf32>
    %15 = arith.mulf %14, %12 : vector<16x128xf32>
    %cst_9 = arith.constant 5.000000e-01 : f32
    %16 = vector.broadcast %cst_9 : f32 to vector<16x128xf32>
    %17 = arith.mulf %8, %16 : vector<16x128xf32>
    %cst_10 = arith.constant 3.000000e+00 : f32
    %18 = vector.broadcast %cst_10 : f32 to vector<16x128xf32>
    %19 = arith.addf %17, %18 : vector<16x128xf32>
    %cst_11 = arith.constant 1.000000e+00 : f32
    %20 = vector.broadcast %cst_11 : f32 to vector<16x128xf32>
    %21 = arith.divf %20, %19 : vector<16x128xf32>
    %22 = arith.mulf %21, %21 : vector<16x128xf32>
    %cst_12 = arith.constant 0.00118582591 : f32
    %23 = vector.broadcast %cst_12 : f32 to vector<16x128xf32>
    %24 = arith.mulf %22, %23 : vector<16x128xf32>
    %cst_13 = arith.constant -1.562500e-03 : f32
    %25 = vector.broadcast %cst_13 : f32 to vector<16x128xf32>
    %26 = arith.addf %25, %24 : vector<16x128xf32>
    %27 = arith.mulf %22, %26 : vector<16x128xf32>
    %cst_14 = arith.constant 0.00520833349 : f32
    %28 = vector.broadcast %cst_14 : f32 to vector<16x128xf32>
    %29 = arith.addf %28, %27 : vector<16x128xf32>
    %30 = arith.mulf %22, %29 : vector<16x128xf32>
    %cst_15 = arith.constant -1.250000e-01 : f32
    %31 = vector.broadcast %cst_15 : f32 to vector<16x128xf32>
    %32 = arith.addf %31, %30 : vector<16x128xf32>
    %33 = arith.mulf %21, %32 : vector<16x128xf32>
    %cst_16 = arith.constant 1.000000e+00 : f32
    %34 = vector.broadcast %cst_16 : f32 to vector<16x128xf32>
    %35 = arith.addf %17, %34 : vector<16x128xf32>
    %36 = arith.mulf %17, %35 : vector<16x128xf32>
    %cst_17 = arith.constant 2.000000e+00 : f32
    %37 = vector.broadcast %cst_17 : f32 to vector<16x128xf32>
    %38 = arith.addf %17, %37 : vector<16x128xf32>
    %39 = arith.mulf %36, %38 : vector<16x128xf32>
    %cst_18 = arith.constant 5.000000e-01 : f32
    %40 = vector.broadcast %cst_18 : f32 to vector<16x128xf32>
    %41 = arith.addf %17, %40 : vector<16x128xf32>
    %cst_19 = arith.constant 1.500000e+00 : f32
    %42 = vector.broadcast %cst_19 : f32 to vector<16x128xf32>
    %43 = arith.addf %17, %42 : vector<16x128xf32>
    %44 = arith.mulf %41, %43 : vector<16x128xf32>
    %cst_20 = arith.constant 2.500000e+00 : f32
    %45 = vector.broadcast %cst_20 : f32 to vector<16x128xf32>
    %46 = arith.addf %17, %45 : vector<16x128xf32>
    %47 = arith.mulf %44, %46 : vector<16x128xf32>
    %48 = arith.divf %39, %47 : vector<16x128xf32>
    %49 = math.log %48 : vector<16x128xf32>
    %50 = arith.mulf %19, %12 : vector<16x128xf32>
    %cst_21 = arith.constant 0.318309873 : f32
    %51 = vector.broadcast %cst_21 : f32 to vector<16x128xf32>
    %52 = arith.mulf %50, %51 : vector<16x128xf32>
    %53 = math.log %52 : vector<16x128xf32>
    %cst_22 = arith.constant 5.000000e-01 : f32
    %54 = vector.broadcast %cst_22 : f32 to vector<16x128xf32>
    %55 = arith.mulf %54, %53 : vector<16x128xf32>
    %56 = arith.addf %55, %33 : vector<16x128xf32>
    %57 = arith.addf %56, %49 : vector<16x128xf32>
    %cst_23 = arith.constant 1.000000e+00 : f32
    %58 = vector.broadcast %cst_23 : f32 to vector<16x128xf32>
    %59 = arith.addf %8, %58 : vector<16x128xf32>
    %cst_24 = arith.constant 0.000000e+00 : f32
    %60 = vector.broadcast %cst_24 : f32 to vector<16x128xf32>
    %61 = arith.subf %60, %59 : vector<16x128xf32>
    %cst_25 = arith.constant 5.000000e-01 : f32
    %62 = vector.broadcast %cst_25 : f32 to vector<16x128xf32>
    %63 = arith.mulf %61, %62 : vector<16x128xf32>
    %cst_26 = arith.constant 1.000000e+00 : f32
    %64 = vector.broadcast %cst_26 : f32 to vector<16x128xf32>
    %65 = arith.addf %64, %15 : vector<16x128xf32>
    %66 = math.log %65 : vector<16x128xf32>
    %67 = arith.mulf %63, %66 : vector<16x128xf32>
    %68 = arith.addf %57, %67 : vector<16x128xf32>
    %c0_27 = arith.constant 0 : index
    %c0_28 = arith.constant 0 : index
    %69 = vector.load %arg7[%c0_27, %c0_28] : memref<16x128xf32, #tpu.memory_space<vmem>>, vector<16x128xf32>
    %70 = arith.addf %69, %68 : vector<16x128xf32>
    %c0_29 = arith.constant 0 : index
    %c0_30 = arith.constant 0 : index
    %71 = vector.load %arg7[%c0_29, %c0_30] : memref<16x128xf32, #tpu.memory_space<vmem>>, vector<16x128xf32>
    tpu.vector_store %arg7[%c0_29, %c0_30], %70 {strides = array<i32>} : memref<16x128xf32, #tpu.memory_space<vmem>>, vector<16x128xf32>,
    %c0_i32_31 = arith.constant 0 : i32
    %72 = arith.cmpi eq, %arg1, %c0_i32_31 : i32
    %73 = arith.extui %72 : i1 to i32
    %c0_i32_32 = arith.constant 0 : i32
    %74 = arith.cmpi ne, %73, %c0_i32_32 : i32
    scf.if %74 {
      %c0_33 = arith.constant 0 : index
      %c0_34 = arith.constant 0 : index
      %75 = vector.load %arg7[%c0_33, %c0_34] : memref<16x128xf32, #tpu.memory_space<vmem>>, vector<16x128xf32>
      %76 = vector.shape_cast %75 : vector<16x128xf32> to vector<1x16x128xf32>
      %cst_35 = arith.constant dense<0.000000e+00> : vector<1xf32>
      %77 = vector.multi_reduction <add>, %76, %cst_35 [1, 2] : vector<1x16x128xf32> to vector<1xf32>
      %78 = vector.shape_cast %77 : vector<1xf32> to vector<1x1x1xf32>
      %79 = vector.extract %78[0, 0, 0] : f32 from vector<1x1x1xf32>
      %80 = vector.broadcast %79 : f32 to vector<1x8x128xf32>
      %c0_36 = arith.constant 0 : index
      %c0_37 = arith.constant 0 : index
      %c0_38 = arith.constant 0 : index
      %81 = vector.load %arg6[%c0_36, %c0_37, %c0_38] : memref<1x8x128xf32, #tpu.memory_space<vmem>>, vector<1x8x128xf32>
      tpu.vector_store %arg6[%c0_36, %c0_37, %c0_38], %80 {strides = array<i32>} : memref<1x8x128xf32, #tpu.memory_space<vmem>>, vector<1x8x128xf32>,
    } else {
    }
    return
  }
  func.func @transform_0(%arg0: i32, %arg1: i32) -> (i32, i32) {
    %c1_i32 = arith.constant 1 : i32
    %0 = arith.muli %arg0, %c1_i32 : i32
    %1 = arith.addi %0, %arg1 : i32
    %c0_i32 = arith.constant 0 : i32
    %c0_i32_0 = arith.constant 0 : i32
    return %1, %c0_i32 : i32, i32
  }
  func.func @transform_1(%arg0: i32, %arg1: i32) -> (i32, i32) {
    %c1_i32 = arith.constant 1 : i32
    %0 = arith.muli %arg0, %c1_i32 : i32
    %1 = arith.addi %0, %arg1 : i32
    %c0_i32 = arith.constant 0 : i32
    %c0_i32_0 = arith.constant 0 : i32
    return %1, %c0_i32 : i32, i32
  }
  func.func @transform_2(%arg0: i32, %arg1: i32) -> (i32, i32) {
    %c1_i32 = arith.constant 1 : i32
    %0 = arith.muli %arg0, %c1_i32 : i32
    %1 = arith.addi %0, %arg1 : i32
    %c0_i32 = arith.constant 0 : i32
    %c0_i32_0 = arith.constant 0 : i32
    return %1, %c0_i32 : i32, i32
  }
  func.func @transform_3(%arg0: i32, %arg1: i32) -> (i32, i32) {
    %c1_i32 = arith.constant 1 : i32
    %0 = arith.muli %arg0, %c1_i32 : i32
    %1 = arith.addi %0, %arg1 : i32
    %c0_i32 = arith.constant 0 : i32
    %c0_i32_0 = arith.constant 0 : i32
    return %1, %c0_i32 : i32, i32
  }
  func.func @transform_4(%arg0: i32, %arg1: i32) -> (i32, i32, i32) {
    %c0_i32 = arith.constant 0 : i32
    %c0_i32_0 = arith.constant 0 : i32
    %c0_i32_1 = arith.constant 0 : i32
    return %arg0, %c0_i32, %c0_i32_0 : i32, i32, i32
  }
}

</mosaic_0001>

<bundles_post_ra>
// kernel: tpu_custom_call.1
= control target key start
LH: loop header
LB: loop body
LE: loop exit
PB: predicated region body
PF: predicated region fallthrough
CT: control target
= control target key end

     0   :  { %9 = vsyncpa [#allocation4], 0  ;;  %s526_s0 = inlined_call_operand.hbm [shape: f32[16,128], index: 0, kind: input, shape index: {}]   ;;  %s527_s1 = inlined_call_operand.hbm [shape: f32[16,128], index: 1, kind: input, shape index: {}]   ;;  %s528_s2 = inlined_call_operand.hbm [shape: f32[16,128], index: 2, kind: input, shape index: {}]   ;;  %s529_s3 = inlined_call_operand.hbm [shape: f32[16,128], index: 3, kind: input, shape index: {}]   ;;  %s530_s4 = inlined_call_operand.hbm [shape: f32[1,8,128], index: 4, kind: output, shape index: {}]  }
   0x1   :  { %10 = vsyncpa [#allocation7], 0 }
   0x2   :  { %11 = vsyncpa [#allocation10], 0 }
   0x3   :  { %12 = vsyncpa [#allocation5], 0  ;;  %s398_s15 = smov [#allocation6]   ;;  %s399_s17 = smov [#allocation3]  }
   0x4   :  { %s38_s16 = sshll.u32 %s398_s15, 4  ;;  %s22_s18 = sshll.u32 %s399_s17, 4  ;;  %s39_s16 = int_to_ptr.vmem [resolvable:$true] %s38_s16  ;;  %s430_s18 = int_to_ptr.vmem [resolvable:$true] %s22_s18 }
   0x5   :  { %s280_s21 = scalar_lea.hbm %s527_s1, 256 }
   0x6   :  { %p281_p0 = scmp.ne.s32.totalorder %s527_s1, %s280_s21  ;;  %p284_p1 = scmp.lt.u32.totalorder %s280_s21, %s527_s1 }
   0x8   :  { %p286_p2 = pnand %p284_p1, %p281_p0 }
   0xa   :  { %289 = shalt.err (!%p286_p2)
}
   0xb   :  { %s290_s26 = scalar_lea.vmem %s39_s16, 256  ;;  %p295_p4 = scmp.lt.s32.totalorder %s39_s16, %s39_s16 }
   0xc   :  { %p291_p3 = scmp.ne.s32.totalorder %s39_s16, %s290_s26  ;;  %p296_p5 = scmp.lt.s32.totalorder %s290_s26, %s290_s26 }
   0xe   :  { %p297_p6 = por %p296_p5, %p295_p4 }
  0x10   :  { %p298_p7 = pnand %p297_p6, %p291_p3 }
  0x12   :  { %301 = shalt.err (!%p298_p7)
}
  0x13   :  { %s400_s27 = smov 128   ;;  %s401_s28 = smov 8  }
  0x14   :  { %44 = dma.hbm_to_vmem [thread:$0]  %s527_s1, 256, %s39_s16, [#allocation7], %s400_s27, %s400_s27, %s401_s28  }
  0x15   :  { %s302_s7 = scalar_lea.hbm %s526_s0, 256 }
  0x16   :  { %p303_p8 = scmp.ne.s32.totalorder %s526_s0, %s302_s7  ;;  %p306_p9 = scmp.lt.u32.totalorder %s302_s7, %s526_s0 }
  0x18   :  { %p308_p10 = pnand %p306_p9, %p303_p8 }
  0x1a   :  { %311 = shalt.err (!%p308_p10)
}
  0x1b   :  { %s312_s12 = scalar_lea.vmem %s430_s18, 256  ;;  %p317_p12 = scmp.lt.s32.totalorder %s430_s18, %s430_s18 }
  0x1c   :  { %p313_p11 = scmp.ne.s32.totalorder %s430_s18, %s312_s12  ;;  %p318_p13 = scmp.lt.s32.totalorder %s312_s12, %s312_s12 }
  0x1e   :  { %p319_p0 = por %p318_p13, %p317_p12 }
  0x20   :  { %p320_p1 = pnand %p319_p0, %p313_p11 }
  0x22   :  { %323 = shalt.err (!%p320_p1)
}
  0x23   :  { %28 = dma.hbm_to_vmem [thread:$0]  %s526_s0, 256, %s430_s18, [#allocation4], %s400_s27, %s400_s27, %s401_s28  }
  0x24   :  { %s402_s14 = smov [#allocation8]   ;;  %s403_s16 = smov [#allocation9]  }
  0x25   :  { %s54_s15 = sshll.u32 %s402_s14, 4  ;;  %s70_s17 = sshll.u32 %s403_s16, 4  ;;  %s55_s15 = int_to_ptr.vmem [resolvable:$true] %s54_s15  ;;  %s467_s17 = int_to_ptr.vmem [resolvable:$true] %s70_s17 }
  0x26   :  { %s324_s21 = scalar_lea.hbm %s528_s2, 256 }
  0x27   :  { %p325_p2 = scmp.ne.s32.totalorder %s528_s2, %s324_s21  ;;  %p328_p3 = scmp.lt.u32.totalorder %s324_s21, %s528_s2 }
  0x29   :  { %p330_p4 = pnand %p328_p3, %p325_p2 }
  0x2b   :  { %333 = shalt.err (!%p330_p4)
}
  0x2c   :  { %s334_s0 = scalar_lea.vmem %s55_s15, 256  ;;  %p339_p6 = scmp.lt.s32.totalorder %s55_s15, %s55_s15 }
  0x2d   :  { %p335_p5 = scmp.ne.s32.totalorder %s55_s15, %s334_s0  ;;  %p340_p7 = scmp.lt.s32.totalorder %s334_s0, %s334_s0 }
  0x2f   :  { %p341_p8 = por %p340_p7, %p339_p6 }
  0x31   :  { %p342_p9 = pnand %p341_p8, %p335_p5 }
  0x33   :  { %345 = shalt.err (!%p342_p9)
}
  0x34   :  { %60 = dma.hbm_to_vmem [thread:$0]  %s528_s2, 256, %s55_s15, [#allocation7], %s400_s27, %s400_s27, %s401_s28  }
  0x35   :  { %s346_s5 = scalar_lea.hbm %s529_s3, 256 }
  0x36   :  { %p347_p10 = scmp.ne.s32.totalorder %s529_s3, %s346_s5  ;;  %p350_p11 = scmp.lt.u32.totalorder %s346_s5, %s529_s3 }
  0x38   :  { %p352_p12 = pnand %p350_p11, %p347_p10 }
  0x3a   :  { %355 = shalt.err (!%p352_p12)
}
  0x3b   :  { %s356_s10 = scalar_lea.vmem %s467_s17, 256  ;;  %p361_p0 = scmp.lt.s32.totalorder %s467_s17, %s467_s17 }
  0x3c   :  { %p357_p13 = scmp.ne.s32.totalorder %s467_s17, %s356_s10  ;;  %p362_p1 = scmp.lt.s32.totalorder %s356_s10, %s356_s10 }
  0x3e   :  { %p363_p2 = por %p362_p1, %p361_p0 }
  0x40   :  { %p364_p3 = pnand %p363_p2, %p357_p13 }
  0x42   :  { %367 = shalt.err (!%p364_p3)
}
  0x43   :  { %76 = dma.hbm_to_vmem [thread:$0]  %s529_s3, 256, %s467_s17, [#allocation10], %s400_s27, %s400_s27, %s401_s28  }
  0x44   :  { %390 = dma.done.wait [#allocation4], 256  }
  0x45   :  { %391 = vsyncadd [#allocation4], 4294967040 }
  0x46   :  { %392 = dma.done.wait [#allocation7], 512  }
  0x47   :  { %393 = vsyncadd [#allocation7], 4294966784 }
  0x48   :  { %394 = dma.done.wait [#allocation10], 256  }
  0x49   :  { %395 = vsyncadd [#allocation10], 4294967040  ;;  %v107_v0 = vld [vmem:[#allocation8] sm:$0xff]  ;;  %v108_v1 = vld [vmem:[#allocation8 + $0x8] sm:$0xff]  ;;  %s404_s3 = smov [#allocation11]  }
  0x4a   :  { %v109_v2 = vadd.f32 1e-06, %v107_v0  ;;  %v110_v3 = vadd.f32 1e-06, %v108_v1  ;;  %v504_v4 = vld [vmem:[#allocation9] sm:$0xff]  ;;  %v506_v5 = vld [vmem:[#allocation9 + $0x8] sm:$0xff] }
  0x4b   :  { %v127_v6 = vmul.f32 0.5, %v504_v4  ;;  %v128_v7 = vmul.f32 0.5, %v506_v5  ;;  %v103_v15 = vld [vmem:[#allocation3] sm:$0xff]  ;;  %v105_v16 = vld [vmem:[#allocation6] sm:$0xff]  ;;  %v104_v20 = vld [vmem:[#allocation3 + $0x8] sm:$0xff]  ;;  %v191_v0 = vadd.f32 1.0, %v504_v4 }
  0x4c   :  { %v113_v8 = vmul.f32 %v109_v2, %v109_v2  ;;  %v114_v9 = vmul.f32 %v110_v3, %v110_v3  ;;  %v106_v21 = vld [vmem:[#allocation6 + $0x8] sm:$0xff]  ;;  %v121_v26 = vsub.f32 %v103_v15, %v105_v16  ;;  %v192_v2 = vadd.f32 1.0, %v506_v5  ;;  %s236_s27 = sshll.u32 %s404_s3, 4  ;;  %s237_s27 = int_to_ptr.vmem [resolvable:$true] %s236_s27 }
  0x4d   :  { %v129_v10 = vadd.f32 3.0, %v127_v6  ;;  %v130_v13 = vadd.f32 3.0, %v128_v7  ;;  %v159_v14 = vadd.f32 0.5, %v127_v6  ;;  %v160_v17 = vadd.f32 0.5, %v128_v7  ;;  %s368_s12 = scalar_lea.vmem %s237_s27, 128  ;;  %p373_p5 = scmp.lt.s32.totalorder %s237_s27, %s237_s27 }
  0x4e   :  { %v115_v11 = vmul.f32 %v113_v8, %v504_v4  ;;  %v116_v12 = vmul.f32 %v114_v9, %v506_v5  ;;  %v161_v18 = vadd.f32 1.5, %v127_v6  ;;  %v162_v19 = vadd.f32 1.5, %v128_v7  ;;  %p369_p4 = scmp.ne.s32.totalorder %s237_s27, %s368_s12  ;;  %p374_p6 = scmp.lt.s32.totalorder %s368_s12, %s368_s12 }
  0x4f   :  { %256 = vrcp.f32 %v129_v10  ;;  %v165_v22 = vadd.f32 2.5, %v127_v6  ;;  %v166_v25 = vadd.f32 2.5, %v128_v7  ;;  %v122_v27 = vsub.f32 %v104_v20, %v106_v21 }
  0x50   :  { %258 = vrcp.f32 %v115_v11  ;;  %v163_v23 = vmul.f32 %v161_v18, %v159_v14  ;;  %v164_v24 = vmul.f32 %v162_v19, %v160_v17  ;;  %v151_v30 = vadd.f32 1.0, %v127_v6  ;;  %p375_p7 = por %p374_p6, %p373_p5 }
  0x51   :  { %260 = vrcp.f32 %v116_v12  ;;  %v152_v31 = vadd.f32 1.0, %v128_v7  ;;  %v123_v32 = vmul.f32 %v121_v26, %v121_v26  ;;  %v124_v33 = vmul.f32 %v122_v27, %v122_v27 }
  0x52   :  { %262 = vrcp.f32 %v130_v13  ;;  %v167_v28 = vmul.f32 %v165_v22, %v163_v23  ;;  %v168_v29 = vmul.f32 %v166_v25, %v164_v24  ;;  %v153_v35 = vmul.f32 %v151_v30, %v127_v6  ;;  %p376_p8 = pnand %p375_p7, %p369_p4 }
  0x53   :  { %v155_v36 = vadd.f32 2.0, %v127_v6  ;;  %v154_v39 = vmul.f32 %v152_v31, %v128_v7  ;;  %v156_v40 = vadd.f32 2.0, %v128_v7  ;;  %v193_v8 = vsub.f32 0.0, %v191_v0 }
  0x54   :  { %264 = vrcp.f32 %v167_v28 }
  0x55   :  { %266 = vrcp.f32 %v168_v29  ;;  %v157_v49 = vmul.f32 %v155_v36, %v153_v35  ;;  %v158_v53 = vmul.f32 %v156_v40, %v154_v39  ;;  %v195_v16 = vmul.f32 0.5, %v193_v8 }
  0x59   :  { %v257_v34 = vpop.eup %256 }
  0x5a   :  { %v259_v37 = vpop.eup %258  ;;  %v135_v38 = vmul.f32 %v257_v34, %v257_v34 }
  0x5b   :  { %v261_v41 = vpop.eup %260  ;;  %v125_v42 = vmul.f32 %v259_v37, %v123_v32  ;;  %v177_v43 = vmul.f32 %v259_v37, %v129_v10  ;;  %v194_v10 = vsub.f32 0.0, %v192_v2 }
  0x5c   :  { %v263_v44 = vpop.eup %262  ;;  %v126_v45 = vmul.f32 %v261_v41, %v124_v33  ;;  %v137_v46 = vmul.f32 0.0011858259, %v135_v38  ;;  %v178_v47 = vmul.f32 %v261_v41, %v130_v13 }
  0x5d   :  { %v136_v48 = vmul.f32 %v263_v44, %v263_v44  ;;  %v179_v50 = vmul.f32 0.31830987, %v177_v43  ;;  %v197_v51 = vadd.f32 1.0, %v125_v42  ;;  %v196_v19 = vmul.f32 0.5, %v194_v10 }
  0x5e   :  { %v139_v52 = vadd.f32 -0.0015625, %v137_v46  ;;  %v180_v54 = vmul.f32 0.31830987, %v178_v47  ;;  %v198_v55 = vadd.f32 1.0, %v126_v45  ;;  %v265_v57 = vpop.eup %264 }
  0x5f   :  { %v138_v56 = vmul.f32 0.0011858259, %v136_v48  ;;  %268 = vlog2.f32 %v179_v50  ;;  %v267_v59 = vpop.eup %266  ;;  %v170_v61 = vmul.f32 %v265_v57, %v157_v49 }
  0x60   :  { %v141_v58 = vmul.f32 %v139_v52, %v135_v38  ;;  %270 = vlog2.f32 %v180_v54  ;;  %v172_v63 = vmul.f32 %v267_v59, %v158_v53 }
  0x61   :  { %v140_v60 = vadd.f32 -0.0015625, %v138_v56  ;;  %272 = vlog2.f32 %v197_v51 }
  0x62   :  { %v143_v62 = vadd.f32 0.0052083335, %v141_v58  ;;  %274 = vlog2.f32 %v198_v55 }
  0x63   :  { %v142_v1 = vmul.f32 %v140_v60, %v136_v48  ;;  %276 = vlog2.f32 %v170_v61 }
  0x64   :  { %v145_v3 = vmul.f32 %v143_v62, %v135_v38  ;;  %278 = vlog2.f32 %v172_v63 }
  0x65   :  { %v144_v6 = vadd.f32 0.0052083335, %v142_v1 }
  0x66   :  { %v147_v7 = vadd.f32 -0.125, %v145_v3 }
  0x67   :  { %v146_v9 = vmul.f32 %v144_v6, %v136_v48 }
  0x68   :  { %v149_v14 = vmul.f32 %v257_v34, %v147_v7 }
  0x69   :  { %v269_v11 = vpop.eup %268  ;;  %v148_v12 = vadd.f32 -0.125, %v146_v9 }
  0x6a   :  { %v271_v13 = vpop.eup %270  ;;  %v182_v15 = vmul.f32 0.6931472, %v269_v11 }
  0x6b   :  { %v273_v17 = vpop.eup %272  ;;  %v150_v4 = vmul.f32 %v263_v44, %v148_v12  ;;  %v184_v18 = vmul.f32 0.6931472, %v271_v13 }
  0x6c   :  { %v275_v20 = vpop.eup %274  ;;  %v185_v21 = vmul.f32 0.5, %v182_v15  ;;  %v200_v5 = vmul.f32 0.6931472, %v273_v17 }
  0x6d   :  { %v277_v22 = vpop.eup %276  ;;  %v186_v23 = vmul.f32 0.5, %v184_v18  ;;  %v202_v24 = vmul.f32 0.6931472, %v275_v20 }
  0x6e   :  { %v279_v25 = vpop.eup %278  ;;  %v174_v26 = vmul.f32 0.6931472, %v277_v22  ;;  %v187_v27 = vadd.f32 %v185_v21, %v149_v14  ;;  %v203_v28 = vmul.f32 %v200_v5, %v195_v16 }
  0x6f   :  { %v176_v29 = vmul.f32 0.6931472, %v279_v25  ;;  %v188_v30 = vadd.f32 %v186_v23, %v150_v4  ;;  %v204_v31 = vmul.f32 %v202_v24, %v196_v19 }
  0x70   :  { %v189_v32 = vadd.f32 %v187_v27, %v174_v26 }
  0x71   :  { %v190_v33 = vadd.f32 %v188_v30, %v176_v29 }
  0x72   :  { %v205_v34 = vadd.f32 %v203_v28, %v189_v32 }
  0x73   :  { %v206_v35 = vadd.f32 %v204_v31, %v190_v33 }
  0x75   :  { %v218_v36 = vadd.f32 %v206_v35, %v205_v34 }
  0x77   :  { %219 = vadd.xlane.f32.xlu0 %v218_v36 }
 0x104   :  { %v220_v37 = vpop.xlane.xlu0 %219 }
 0x105   :  { %v221_v38 = vrot.slane %v220_v37, 4 }
 0x107   :  { %v222_v39 = vadd.f32 %v221_v38, %v220_v37 }
 0x109   :  { %v223_v40 = vrot.slane %v222_v39, 2 }
 0x10b   :  { %v224_v41 = vadd.f32 %v223_v40, %v222_v39 }
 0x10d   :  { %v225_v42 = vrot.slane %v224_v41, 1 }
 0x10f   :  { %v226_v43 = vadd.f32 %v225_v42, %v224_v41 }
 0x111   :  { %247 = vpush %v226_v43 }
 0x142   :  { %s248_s28 = spop %247 }
 0x143   :  { %v228_v44 = vstv %s248_s28 }
 0x144   :  { %229 = vst [vmem:[#allocation11] sm:$0xff] %v228_v44 }
 0x145   :  { %379 = shalt.err (!%p376_p8)
}
 0x146   :  { %s380_s14 = scalar_lea.hbm %s530_s4, 128 }
 0x147   :  { %p381_p9 = scmp.ne.s32.totalorder %s530_s4, %s380_s14  ;;  %p384_p10 = scmp.lt.u32.totalorder %s380_s14, %s530_s4 }
 0x149   :  { %p386_p11 = pnand %p384_p10, %p381_p9 }
 0x14b   :  { %389 = shalt.err (!%p386_p11)
}
 0x14c   :  { %239 = dma.vmem_to_hbm [thread:$0]  %s237_s27, 128, %s530_s4, [#allocation5]  }
 0x14d   :  { %396 = dma.done.wait [#allocation5], 128  }
 0x14e   :  { %397 = vsyncadd [#allocation5], 4294967168 }
 0x14f   :  { %243 = vsyncpa [#allocation4], 1 }
 0x150   :  { %244 = vsyncpa [#allocation7], 1 }
 0x151   :  { %245 = vsyncpa [#allocation10], 1 }
 0x152   :  { %246 = vsyncpa [#allocation5], 1 }

</bundles_post_ra>
